<compile_context>
chip_gen: v7x
topology: tpu7x:2x2x1
jax: 0.10.0
libtpu: 0.0.40
codegen_flags: <defaults>
</compile_context>

<pallas_src>
import functools

import jax
import jax.numpy as jnp
from jax.experimental import pallas as pl
from jax.experimental.pallas import tpu as pltpu


def _round_up(n, m):
    return ((n + m - 1) // m) * m


def _pad_rows(a, rows):
    pad = rows - a.shape[0]
    if pad == 0:
        return a
    return jnp.pad(a, ((0, pad),) + ((0, 0),) * (a.ndim - 1))


def _sum11(a):
    # (R, C) -> (1, 1) via two single-axis reductions.
    return jnp.sum(jnp.sum(a, axis=1, keepdims=True), axis=0, keepdims=True)


def _pick_tile(batch):
    # Whole (padded) batch in one step when small; 128-row tiles otherwise.
    return _round_up(max(batch, 1), 8) if batch <= 128 else 128


# ---------------------------------------------------------------------------
# Kernel 1: image centre loss only (y == 1 path)
#   loss = mean_i clip(||x_i - centers[labels_i]||^2, 1e-12, 1e12)
# ---------------------------------------------------------------------------
def _image_centre_kernel(x_ref, g_ref, loss_ref, acc_ref, *, batch, tile):
    i = pl.program_id(0)

    @pl.when(i == 0)
    def _init():
        acc_ref[...] = jnp.zeros_like(acc_ref)

    x = x_ref[...].astype(jnp.float32)             # (T, D)
    g = g_ref[...].astype(jnp.float32)             # (T, D) = centers[labels] rows
    dx = x - g
    d = jnp.sum(dx * dx, axis=1, keepdims=True)    # (T, 1)
    d = jnp.clip(d, 1e-12, 1e12)
    rows = jax.lax.broadcasted_iota(jnp.int32, (tile, 1), 0) + i * tile
    acc_ref[...] += jnp.where(rows < batch, d, 0.0)

    @pl.when(i == pl.num_programs(0) - 1)
    def _fin():
        loss_ref[...] = (jnp.sum(acc_ref[...], axis=0, keepdims=True)
                         / jnp.float32(batch))


def image_centre_loss(x, labels, centers):
    B, D = x.shape
    labels = labels.astype(jnp.int32).reshape(B)
    G = jnp.take(centers, labels, axis=0).astype(x.dtype)   # (B, D) single gather
    T = _pick_tile(B)
    Bp = _round_up(B, T)
    xp, Gp = _pad_rows(x, Bp), _pad_rows(G, Bp)
    kernel = functools.partial(_image_centre_kernel, batch=B, tile=T)
    out = pl.pallas_call(
        kernel,
        out_shape=jax.ShapeDtypeStruct((1, 1), jnp.float32),
        grid_spec=pltpu.PrefetchScalarGridSpec(
            num_scalar_prefetch=0,
            grid=(Bp // T,),
            in_specs=[
                pl.BlockSpec((T, D), lambda i: (i, 0)),   # x row tile
                pl.BlockSpec((T, D), lambda i: (i, 0)),   # gathered centers tile
            ],
            out_specs=pl.BlockSpec((1, 1), lambda i: (0, 0)),
            scratch_shapes=[pltpu.VMEM((T, 1), jnp.float32)],
        ),
        compiler_params=pltpu.CompilerParams(dimension_semantics=("arbitrary",)),
        cost_estimate=pl.CostEstimate(
            flops=3 * Bp * D, transcendentals=0,
            bytes_accessed=4 * (2 * Bp * D) + 4),
    )(xp, Gp)
    return out[0, 0]


# ---------------------------------------------------------------------------
# Kernel 2 (fused, y != 1 path): image centre loss + class centre loss.
#   class loss over all ordered batch pairs (i, j):
#     val = clip(mean_d (G_i - G_j)^2, 1e-12, 1e12)   with G = centers[labels]
#     intra (l2_i == l2_j) -> val ; inter -> 1/(1+val)
#     loss2 = mean(intra) + (mean(inter) if any inter else 0)
#   val is computed on the MXU per (i, j) tile: |gi|^2 + |gj|^2 - 2 gi.gj.
# ---------------------------------------------------------------------------
def _fused_centre_kernel(x_ref, gi_ref, gj_ref, l2c_ref, l2r_ref,
                         loss_ref, acc_img, acc_intra, acc_inter, acc_icnt,
                         *, batch, feat_dim, tile):
    i = pl.program_id(0)
    j = pl.program_id(1)

    @pl.when(jnp.logical_and(i == 0, j == 0))
    def _init():
        acc_img[...] = jnp.zeros_like(acc_img)
        acc_intra[...] = jnp.zeros_like(acc_intra)
        acc_inter[...] = jnp.zeros_like(acc_inter)
        acc_icnt[...] = jnp.zeros_like(acc_icnt)

    gi = gi_ref[...].astype(jnp.float32)            # (T, D) centers rows, i-tile
    gj = gj_ref[...].astype(jnp.float32)            # (T, D) centers rows, j-tile

    rows = jax.lax.broadcasted_iota(jnp.int32, (tile, 1), 0) + i * tile   # (T, 1)
    cols = jax.lax.broadcasted_iota(jnp.int32, (1, tile), 1) + j * tile   # (1, T)
    row_valid = rows < batch
    col_valid = cols < batch

    # ---- image centre loss: once per i-tile (j == 0) ----
    @pl.when(j == 0)
    def _img():
        xr = x_ref[...].astype(jnp.float32)
        dx = xr - gi
        d = jnp.clip(jnp.sum(dx * dx, axis=1, keepdims=True), 1e-12, 1e12)
        acc_img[...] += jnp.where(row_valid, d, 0.0)

    # ---- pairwise class-centre loss via MXU Gram matrix ----
    s = jax.lax.dot_general(gi, gj, (((1,), (1,)), ((), ())),
                            preferred_element_type=jnp.float32)           # (T, T)
    sq_i = jnp.sum(gi * gi, axis=1, keepdims=True)                        # (T, 1)
    ones = jnp.ones((1, feat_dim), jnp.float32)
    sq_j = jax.lax.dot_general(ones, gj * gj, (((1,), (1,)), ((), ())),
                               preferred_element_type=jnp.float32)        # (1, T)
    val = (sq_i + sq_j - 2.0 * s) * (1.0 / jnp.float32(feat_dim))
    val = jnp.clip(jnp.maximum(val, 0.0), 1e-12, 1e12)                    # (T, T)

    same = l2c_ref[...] == l2r_ref[...]                                   # (T, T)
    valid = jnp.logical_and(row_valid, col_valid)                         # (T, T)
    intra_m = jnp.logical_and(valid, same)
    inter_m = jnp.logical_and(valid, jnp.logical_not(same))

    acc_intra[...] += jnp.where(intra_m, val, 0.0)
    acc_inter[...] += jnp.where(inter_m, 1.0 / (1.0 + val), 0.0)
    acc_icnt[...] += intra_m.astype(jnp.float32)

    @pl.when(jnp.logical_and(i == pl.num_programs(0) - 1,
                             j == pl.num_programs(1) - 1))
    def _fin():
        loss1 = (jnp.sum(acc_img[...], axis=0, keepdims=True)
                 / jnp.float32(batch))                                    # (1, 1)
        icnt = _sum11(acc_icnt[...])                                      # >= batch
        isum = _sum11(acc_intra[...])
        esum = _sum11(acc_inter[...])
        ecnt = jnp.float32(batch * batch) - icnt
        loss_intra = isum / icnt
        loss_inter = jnp.where(ecnt > 0.0, esum / jnp.maximum(ecnt, 1.0), 0.0)
        loss_ref[...] = loss1 + loss_intra + loss_inter


def fused_centre_loss(x, labels, labels_2, centers):
    B, D = x.shape
    labels = labels.astype(jnp.int32).reshape(B)
    labels_2 = labels_2.astype(jnp.int32).reshape(B)
    G = jnp.take(centers, labels, axis=0).astype(x.dtype)    # (B, D) single gather
    T = _pick_tile(B)
    Bp = _round_up(B, T)
    NI = Bp // T
    xp, Gp = _pad_rows(x, Bp), _pad_rows(G, Bp)
    l2p = jnp.pad(labels_2, (0, Bp - B), constant_values=-1)
    l2col = l2p.reshape(Bp, 1)                                # (Bp, 1) tile-read
    l2row = l2p.reshape(1, Bp)                                # (1, Bp) lane-major
    kernel = functools.partial(_fused_centre_kernel, batch=B, feat_dim=D, tile=T)
    out = pl.pallas_call(
        kernel,
        out_shape=jax.ShapeDtypeStruct((1, 1), jnp.float32),
        grid_spec=pltpu.PrefetchScalarGridSpec(
            num_scalar_prefetch=0,
            grid=(NI, NI),
            in_specs=[
                pl.BlockSpec((T, D), lambda i, j: (i, 0)),    # x rows (i-tile)
                pl.BlockSpec((T, D), lambda i, j: (i, 0)),    # G rows (i-tile)
                pl.BlockSpec((T, D), lambda i, j: (j, 0)),    # G rows (j-tile)
                pl.BlockSpec((T, 1), lambda i, j: (i, 0)),    # labels_2 column tile
                pl.BlockSpec((1, T), lambda i, j: (0, j)),    # labels_2 row tile
            ],
            out_specs=pl.BlockSpec((1, 1), lambda i, j: (0, 0)),
            scratch_shapes=[
                pltpu.VMEM((T, 1), jnp.float32),   # image-loss partials
                pltpu.VMEM((T, T), jnp.float32),   # intra partials
                pltpu.VMEM((T, T), jnp.float32),   # inter partials
                pltpu.VMEM((T, T), jnp.float32),   # intra counts
            ],
        ),
        compiler_params=pltpu.CompilerParams(
            dimension_semantics=("arbitrary", "arbitrary")),
        cost_estimate=pl.CostEstimate(
            flops=2 * Bp * Bp * D + 3 * Bp * D,
            transcendentals=0,
            bytes_accessed=4 * (Bp * D * (2 + NI) + 2 * Bp) + 4),
    )(xp, Gp, Gp, l2col, l2row)
    return out[0, 0]


# ---------------------------------------------------------------------------
# Module-equivalent wrapper
# ---------------------------------------------------------------------------
class CenterLossPallas:
    def __init__(self, num_classes, patients_class, feat_dim, key,
                 contra_margin=2048, eps=1e-9):
        self.num_classes = num_classes
        self.patients_class = patients_class
        self.feat_dim = feat_dim
        self.contra_margin = contra_margin
        self.eps = eps
        # torch.rand(num_classes, feat_dim) equivalent: uniform [0, 1)
        self.centers = jax.random.uniform(
            key, (num_classes, feat_dim), dtype=jnp.float32)

    def return_center(self, index):
        return self.centers[index]

    def forward(self, x, labels, labels_2, y):
        # NOTE: y is a static Python value, mirroring PyTorch's `if y == 1`.
        if y == 1:
            return image_centre_loss(x, labels, self.centers)
        return fused_centre_loss(x, labels, labels_2, self.centers)


# ---------------------------------------------------------------------------
# Pure-JAX reference (mirrors the PyTorch code) for a sanity check
# ---------------------------------------------------------------------------
def _ref_forward(x, labels, labels_2, y, centers):
    B = x.shape[0]
    distmat = (jnp.sum(x ** 2, axis=1, keepdims=True)
               + jnp.sum(centers ** 2, axis=1)[None, :]
               - 2.0 * x @ centers.T)
    dist = jnp.clip(distmat[jnp.arange(B), labels], 1e-12, 1e12)
    loss1 = dist.mean()
    if y == 1:
        return loss1
    G = centers[labels]
    val = jnp.clip(((G[:, None, :] - G[None, :, :]) ** 2).mean(-1), 1e-12, 1e12)
    intra = labels_2[:, None] == labels_2[None, :]
    loss_intra = jnp.where(intra, val, 0.0).sum() / intra.sum()
    inter_cnt = (~intra).sum()
    loss_inter = jnp.where(
        inter_cnt > 0,
        jnp.where(~intra, 1.0 / (1.0 + val), 0.0).sum() / jnp.maximum(inter_cnt, 1),
        0.0,
    )
    return loss1 + loss_intra + loss_inter


def _run_case(batch, num_classes, patients_class, feat_dim, seed):
    key = jax.random.PRNGKey(seed)
    k_c, k_x, k_l1, k_l2 = jax.random.split(key, 4)
    module = CenterLossPallas(num_classes, patients_class, feat_dim, k_c)
    x = jax.random.normal(k_x, (batch, feat_dim), dtype=jnp.float32)
    labels = jax.random.randint(k_l1, (batch,), 0, num_classes, dtype=jnp.int32)
    labels_2 = jax.random.randint(k_l2, (batch,), 0, patients_class, dtype=jnp.int32)

    loss_full = module.forward(x, labels, labels_2, y=0)   # fused path
    jax.block_until_ready(loss_full)
    loss_img = module.forward(x, labels, labels_2, y=1)    # image-only path
    jax.block_until_ready(loss_img)

    ref_full = _ref_forward(x, labels, labels_2, 0, module.centers)
    ref_img = _ref_forward(x, labels, labels_2, 1, module.centers)
    assert jnp.allclose(loss_full, ref_full, rtol=2e-4, atol=1e-3), (loss_full, ref_full)
    assert jnp.allclose(loss_img, ref_img, rtol=2e-4, atol=1e-3), (loss_img, ref_img)


if __name__ == "__main__":
    # Aligned case: whole batch in one grid step, one (8, 128) slab per input.
    _run_case(batch=8, num_classes=32, patients_class=4, feat_dim=128, seed=0)
    # Ragged case: exercises padding + validity masking (B=5 padded to 8).
    _run_case(batch=5, num_classes=7, patients_class=3, feat_dim=64, seed=0)
    print("KERNEL_OK")
</pallas_src>

<mosaic_0001>
module attributes {stable_mosaic.version = 11 : i64} {
  func.func @_fused_centre_kernel(%arg0: i32, %arg1: i32, %arg2: memref<8x128xf32, #tpu.memory_space<vmem>>, %arg3: memref<8x128xf32, #tpu.memory_space<vmem>>, %arg4: memref<8x128xf32, #tpu.memory_space<vmem>>, %arg5: memref<8x1xi32, #tpu.memory_space<vmem>>, %arg6: memref<1x8xi32, #tpu.memory_space<vmem>>, %arg7: memref<1x1xf32, #tpu.memory_space<vmem>>, %arg8: memref<8x1xf32, #tpu.memory_space<vmem>>, %arg9: memref<8x8xf32, #tpu.memory_space<vmem>>, %arg10: memref<8x8xf32, #tpu.memory_space<vmem>>, %arg11: memref<8x8xf32, #tpu.memory_space<vmem>>) attributes {dimension_semantics = [#tpu.dimension_semantics<arbitrary>, #tpu.dimension_semantics<arbitrary>], iteration_bounds = array<i64: 1, 1>, scalar_prefetch = 0 : i64, scratch_operands = 4 : i64, tpu.core_type = #tpu.core_type<tc>, window_params = [{transform_indices = @transform_0, window_bounds = array<i64: 8, 128>}, {transform_indices = @transform_1, window_bounds = array<i64: 8, 128>}, {transform_indices = @transform_2, window_bounds = array<i64: 8, 128>}, {transform_indices = @transform_3, window_bounds = array<i64: 8, 1>}, {transform_indices = @transform_4, window_bounds = array<i64: 1, 8>}, {pipeline_mode = #tpu.pipeline_mode<synchronous>, transform_indices = @transform_5, window_bounds = array<i64: 1, 1>}]} {
    %c0_i32 = arith.constant 0 : i32
    %0 = arith.cmpi eq, %arg0, %c0_i32 : i32
    %c0_i32_0 = arith.constant 0 : i32
    %1 = arith.cmpi eq, %arg1, %c0_i32_0 : i32
    %2 = arith.andi %0, %1 : i1
    %3 = arith.extui %2 : i1 to i32
    %c0_i32_1 = arith.constant 0 : i32
    %4 = arith.cmpi ne, %3, %c0_i32_1 : i32
    scf.if %4 {
      %cst_43 = arith.constant 0.000000e+00 : f32
      %79 = vector.broadcast %cst_43 : f32 to vector<8x1xf32>
      %c0_44 = arith.constant 0 : index
      %c0_45 = arith.constant 0 : index
      %80 = vector.load %arg8[%c0_44, %c0_45] : memref<8x1xf32, #tpu.memory_space<vmem>>, vector<8x1xf32>
      tpu.vector_store %arg8[%c0_44, %c0_45], %79 {strides = array<i32>} : memref<8x1xf32, #tpu.memory_space<vmem>>, vector<8x1xf32>,
      %cst_46 = arith.constant 0.000000e+00 : f32
      %81 = vector.broadcast %cst_46 : f32 to vector<8x8xf32>
      %c0_47 = arith.constant 0 : index
      %c0_48 = arith.constant 0 : index
      %82 = vector.load %arg9[%c0_47, %c0_48] : memref<8x8xf32, #tpu.memory_space<vmem>>, vector<8x8xf32>
      tpu.vector_store %arg9[%c0_47, %c0_48], %81 {strides = array<i32>} : memref<8x8xf32, #tpu.memory_space<vmem>>, vector<8x8xf32>,
      %cst_49 = arith.constant 0.000000e+00 : f32
      %83 = vector.broadcast %cst_49 : f32 to vector<8x8xf32>
      %c0_50 = arith.constant 0 : index
      %c0_51 = arith.constant 0 : index
      %84 = vector.load %arg10[%c0_50, %c0_51] : memref<8x8xf32, #tpu.memory_space<vmem>>, vector<8x8xf32>
      tpu.vector_store %arg10[%c0_50, %c0_51], %83 {strides = array<i32>} : memref<8x8xf32, #tpu.memory_space<vmem>>, vector<8x8xf32>,
      %cst_52 = arith.constant 0.000000e+00 : f32
      %85 = vector.broadcast %cst_52 : f32 to vector<8x8xf32>
      %c0_53 = arith.constant 0 : index
      %c0_54 = arith.constant 0 : index
      %86 = vector.load %arg11[%c0_53, %c0_54] : memref<8x8xf32, #tpu.memory_space<vmem>>, vector<8x8xf32>
      tpu.vector_store %arg11[%c0_53, %c0_54], %85 {strides = array<i32>} : memref<8x8xf32, #tpu.memory_space<vmem>>, vector<8x8xf32>,
    } else {
    }
    %c0 = arith.constant 0 : index
    %c0_2 = arith.constant 0 : index
    %5 = vector.load %arg3[%c0, %c0_2] : memref<8x128xf32, #tpu.memory_space<vmem>>, vector<8x128xf32>
    %c0_3 = arith.constant 0 : index
    %c0_4 = arith.constant 0 : index
    %6 = vector.load %arg4[%c0_3, %c0_4] : memref<8x128xf32, #tpu.memory_space<vmem>>, vector<8x128xf32>
    %7 = tpu.iota {dimensions = array<i32: 0>} : vector<8x1xi32>
    %c8_i32 = arith.constant 8 : i32
    %8 = arith.muli %arg0, %c8_i32 : i32
    %9 = vector.broadcast %8 : i32 to vector<8x1xi32>
    %10 = arith.addi %7, %9 : vector<8x1xi32>
    %11 = tpu.iota {dimensions = array<i32: 1>} : vector<1x8xi32>
    %c8_i32_5 = arith.constant 8 : i32
    %12 = arith.muli %arg1, %c8_i32_5 : i32
    %13 = vector.broadcast %12 : i32 to vector<1x8xi32>
    %14 = arith.addi %11, %13 : vector<1x8xi32>
    %c8_i32_6 = arith.constant 8 : i32
    %15 = vector.broadcast %c8_i32_6 : i32 to vector<8x1xi32>
    %16 = arith.cmpi slt, %10, %15 : vector<8x1xi32>
    %c8_i32_7 = arith.constant 8 : i32
    %17 = vector.broadcast %c8_i32_7 : i32 to vector<1x8xi32>
    %18 = arith.cmpi slt, %14, %17 : vector<1x8xi32>
    %c0_i32_8 = arith.constant 0 : i32
    %19 = arith.cmpi eq, %arg1, %c0_i32_8 : i32
    %20 = arith.extui %19 : i1 to i32
    %c0_i32_9 = arith.constant 0 : i32
    %21 = arith.cmpi ne, %20, %c0_i32_9 : i32
    scf.if %21 {
      %c0_43 = arith.constant 0 : index
      %c0_44 = arith.constant 0 : index
      %79 = vector.load %arg2[%c0_43, %c0_44] : memref<8x128xf32, #tpu.memory_space<vmem>>, vector<8x128xf32>
      %80 = arith.subf %79, %5 : vector<8x128xf32>
      %81 = arith.mulf %80, %80 : vector<8x128xf32>
      %cst_45 = arith.constant dense<0.000000e+00> : vector<8xf32>
      %82 = vector.multi_reduction <add>, %81, %cst_45 [1] : vector<8x128xf32> to vector<8xf32>
      %83 = vector.shape_cast %82 : vector<8xf32> to vector<8x1xf32>
      %cst_46 = arith.constant 9.99999996E-13 : f32
      %cst_47 = arith.constant 9.99999995E+11 : f32
      %84 = vector.broadcast %cst_46 : f32 to vector<8x1xf32>
      %85 = arith.maximumf %84, %83 : vector<8x1xf32>
      %86 = vector.broadcast %cst_47 : f32 to vector<8x1xf32>
      %87 = arith.minimumf %86, %85 : vector<8x1xf32>
      %c0_48 = arith.constant 0 : index
      %c0_49 = arith.constant 0 : index
      %88 = vector.load %arg8[%c0_48, %c0_49] : memref<8x1xf32, #tpu.memory_space<vmem>>, vector<8x1xf32>
      %cst_50 = arith.constant 0.000000e+00 : f32
      %89 = vector.broadcast %cst_50 : f32 to vector<8x1xf32>
      %90 = arith.select %16, %87, %89 : vector<8x1xi1>, vector<8x1xf32>
      %91 = arith.addf %88, %90 : vector<8x1xf32>
      %c0_51 = arith.constant 0 : index
      %c0_52 = arith.constant 0 : index
      %92 = vector.load %arg8[%c0_51, %c0_52] : memref<8x1xf32, #tpu.memory_space<vmem>>, vector<8x1xf32>
      tpu.vector_store %arg8[%c0_51, %c0_52], %91 {strides = array<i32>} : memref<8x1xf32, #tpu.memory_space<vmem>>, vector<8x1xf32>,
    } else {
    }
    %cst = arith.constant dense<0.000000e+00> : vector<8x8xf32>
    %22 = tpu.matmul %5, %6, %cst {dimension_numbers = #tpu.dot_dimension_numbers<[1], [1], [0], [0], [0, 0, 1, 0], [], []>} : vector<8x128xf32>, vector<8x128xf32>, vector<8x8xf32> -> vector<8x8xf32>
    %23 = arith.mulf %5, %5 : vector<8x128xf32>
    %cst_10 = arith.constant dense<0.000000e+00> : vector<8xf32>
    %24 = vector.multi_reduction <add>, %23, %cst_10 [1] : vector<8x128xf32> to vector<8xf32>
    %25 = vector.shape_cast %24 : vector<8xf32> to vector<8x1xf32>
    %cst_11 = arith.constant 1.000000e+00 : f32
    %26 = vector.broadcast %cst_11 : f32 to vector<1x128xf32>
    %27 = arith.mulf %6, %6 : vector<8x128xf32>
    %cst_12 = arith.constant dense<0.000000e+00> : vector<1x8xf32>
    %28 = tpu.matmul %26, %27, %cst_12 {dimension_numbers = #tpu.dot_dimension_numbers<[1], [1], [0], [0], [0, 0, 1, 0], [], []>} : vector<1x128xf32>, vector<8x128xf32>, vector<1x8xf32> -> vector<1x8xf32>
    %29 = vector.broadcast %25 : vector<8x1xf32> to vector<8x8xf32>
    %30 = vector.broadcast %28 : vector<1x8xf32> to vector<8x8xf32>
    %31 = arith.addf %29, %30 : vector<8x8xf32>
    %cst_13 = arith.constant 2.000000e+00 : f32
    %32 = vector.broadcast %cst_13 : f32 to vector<8x8xf32>
    %33 = arith.mulf %32, %22 : vector<8x8xf32>
    %34 = arith.subf %31, %33 : vector<8x8xf32>
    %cst_14 = arith.constant 1.000000e+00 : f32
    %cst_15 = arith.constant 1.280000e+02 : f32
    %35 = arith.divf %cst_14, %cst_15 : f32
    %36 = vector.broadcast %35 : f32 to vector<8x8xf32>
    %37 = arith.mulf %34, %36 : vector<8x8xf32>
    %cst_16 = arith.constant 0.000000e+00 : f32
    %38 = vector.broadcast %cst_16 : f32 to vector<8x8xf32>
    %39 = arith.maximumf %37, %38 : vector<8x8xf32>
    %cst_17 = arith.constant 9.99999996E-13 : f32
    %cst_18 = arith.constant 9.99999995E+11 : f32
    %40 = vector.broadcast %cst_17 : f32 to vector<8x8xf32>
    %41 = arith.maximumf %40, %39 : vector<8x8xf32>
    %42 = vector.broadcast %cst_18 : f32 to vector<8x8xf32>
    %43 = arith.minimumf %42, %41 : vector<8x8xf32>
    %c0_19 = arith.constant 0 : index
    %c0_20 = arith.constant 0 : index
    %44 = vector.load %arg5[%c0_19, %c0_20] : memref<8x1xi32, #tpu.memory_space<vmem>>, vector<8x1xi32>
    %c0_21 = arith.constant 0 : index
    %c0_22 = arith.constant 0 : index
    %45 = vector.load %arg6[%c0_21, %c0_22] : memref<1x8xi32, #tpu.memory_space<vmem>>, vector<1x8xi32>
    %46 = vector.broadcast %44 : vector<8x1xi32> to vector<8x8xi32>
    %47 = vector.broadcast %45 : vector<1x8xi32> to vector<8x8xi32>
    %48 = arith.cmpi eq, %46, %47 : vector<8x8xi32>
    %49 = vector.broadcast %16 : vector<8x1xi1> to vector<8x8xi1>
    %50 = vector.broadcast %18 : vector<1x8xi1> to vector<8x8xi1>
    %51 = arith.andi %49, %50 : vector<8x8xi1>
    %52 = arith.andi %51, %48 : vector<8x8xi1>
    %cst_23 = arith.constant dense<true> : vector<8x8xi1>
    %53 = arith.xori %48, %cst_23 : vector<8x8xi1>
    %54 = arith.andi %51, %53 : vector<8x8xi1>
    %c0_24 = arith.constant 0 : index
    %c0_25 = arith.constant 0 : index
    %55 = vector.load %arg9[%c0_24, %c0_25] : memref<8x8xf32, #tpu.memory_space<vmem>>, vector<8x8xf32>
    %cst_26 = arith.constant 0.000000e+00 : f32
    %56 = vector.broadcast %cst_26 : f32 to vector<8x8xf32>
    %57 = arith.select %52, %43, %56 : vector<8x8xi1>, vector<8x8xf32>
    %58 = arith.addf %55, %57 : vector<8x8xf32>
    %c0_27 = arith.constant 0 : index
    %c0_28 = arith.constant 0 : index
    %59 = vector.load %arg9[%c0_27, %c0_28] : memref<8x8xf32, #tpu.memory_space<vmem>>, vector<8x8xf32>
    tpu.vector_store %arg9[%c0_27, %c0_28], %58 {strides = array<i32>} : memref<8x8xf32, #tpu.memory_space<vmem>>, vector<8x8xf32>,
    %c0_29 = arith.constant 0 : index
    %c0_30 = arith.constant 0 : index
    %60 = vector.load %arg10[%c0_29, %c0_30] : memref<8x8xf32, #tpu.memory_space<vmem>>, vector<8x8xf32>
    %cst_31 = arith.constant 1.000000e+00 : f32
    %61 = vector.broadcast %cst_31 : f32 to vector<8x8xf32>
    %62 = arith.addf %61, %43 : vector<8x8xf32>
    %cst_32 = arith.constant 1.000000e+00 : f32
    %63 = vector.broadcast %cst_32 : f32 to vector<8x8xf32>
    %64 = arith.divf %63, %62 : vector<8x8xf32>
    %cst_33 = arith.constant 0.000000e+00 : f32
    %65 = vector.broadcast %cst_33 : f32 to vector<8x8xf32>
    %66 = arith.select %54, %64, %65 : vector<8x8xi1>, vector<8x8xf32>
    %67 = arith.addf %60, %66 : vector<8x8xf32>
    %c0_34 = arith.constant 0 : index
    %c0_35 = arith.constant 0 : index
    %68 = vector.load %arg10[%c0_34, %c0_35] : memref<8x8xf32, #tpu.memory_space<vmem>>, vector<8x8xf32>
    tpu.vector_store %arg10[%c0_34, %c0_35], %67 {strides = array<i32>} : memref<8x8xf32, #tpu.memory_space<vmem>>, vector<8x8xf32>,
    %c0_36 = arith.constant 0 : index
    %c0_37 = arith.constant 0 : index
    %69 = vector.load %arg11[%c0_36, %c0_37] : memref<8x8xf32, #tpu.memory_space<vmem>>, vector<8x8xf32>
    %70 = arith.extui %52 : vector<8x8xi1> to vector<8x8xi32>
    %71 = arith.sitofp %70 : vector<8x8xi32> to vector<8x8xf32>
    %72 = arith.addf %69, %71 : vector<8x8xf32>
    %c0_38 = arith.constant 0 : index
    %c0_39 = arith.constant 0 : index
    %73 = vector.load %arg11[%c0_38, %c0_39] : memref<8x8xf32, #tpu.memory_space<vmem>>, vector<8x8xf32>
    tpu.vector_store %arg11[%c0_38, %c0_39], %72 {strides = array<i32>} : memref<8x8xf32, #tpu.memory_space<vmem>>, vector<8x8xf32>,
    %c0_i32_40 = arith.constant 0 : i32
    %74 = arith.cmpi eq, %arg0, %c0_i32_40 : i32
    %c0_i32_41 = arith.constant 0 : i32
    %75 = arith.cmpi eq, %arg1, %c0_i32_41 : i32
    %76 = arith.andi %74, %75 : i1
    %77 = arith.extui %76 : i1 to i32
    %c0_i32_42 = arith.constant 0 : i32
    %78 = arith.cmpi ne, %77, %c0_i32_42 : i32
    scf.if %78 {
      %c0_43 = arith.constant 0 : index
      %c0_44 = arith.constant 0 : index
      %79 = vector.load %arg8[%c0_43, %c0_44] : memref<8x1xf32, #tpu.memory_space<vmem>>, vector<8x1xf32>
      %cst_45 = arith.constant dense<0.000000e+00> : vector<1xf32>
      %80 = vector.multi_reduction <add>, %79, %cst_45 [0] : vector<8x1xf32> to vector<1xf32>
      %81 = vector.shape_cast %80 : vector<1xf32> to vector<1x1xf32>
      %cst_46 = arith.constant 8.000000e+00 : f32
      %82 = vector.broadcast %cst_46 : f32 to vector<1x1xf32>
      %83 = arith.divf %81, %82 : vector<1x1xf32>
      %c0_47 = arith.constant 0 : index
      %c0_48 = arith.constant 0 : index
      %84 = vector.load %arg11[%c0_47, %c0_48] : memref<8x8xf32, #tpu.memory_space<vmem>>, vector<8x8xf32>
      %cst_49 = arith.constant dense<0.000000e+00> : vector<8xf32>
      %85 = vector.multi_reduction <add>, %84, %cst_49 [1] : vector<8x8xf32> to vector<8xf32>
      %86 = vector.shape_cast %85 : vector<8xf32> to vector<8x1xf32>
      %cst_50 = arith.constant dense<0.000000e+00> : vector<1xf32>
      %87 = vector.multi_reduction <add>, %86, %cst_50 [0] : vector<8x1xf32> to vector<1xf32>
      %88 = vector.shape_cast %87 : vector<1xf32> to vector<1x1xf32>
      %c0_51 = arith.constant 0 : index
      %c0_52 = arith.constant 0 : index
      %89 = vector.load %arg9[%c0_51, %c0_52] : memref<8x8xf32, #tpu.memory_space<vmem>>, vector<8x8xf32>
      %cst_53 = arith.constant dense<0.000000e+00> : vector<8xf32>
      %90 = vector.multi_reduction <add>, %89, %cst_53 [1] : vector<8x8xf32> to vector<8xf32>
      %91 = vector.shape_cast %90 : vector<8xf32> to vector<8x1xf32>
      %cst_54 = arith.constant dense<0.000000e+00> : vector<1xf32>
      %92 = vector.multi_reduction <add>, %91, %cst_54 [0] : vector<8x1xf32> to vector<1xf32>
      %93 = vector.shape_cast %92 : vector<1xf32> to vector<1x1xf32>
      %c0_55 = arith.constant 0 : index
      %c0_56 = arith.constant 0 : index
      %94 = vector.load %arg10[%c0_55, %c0_56] : memref<8x8xf32, #tpu.memory_space<vmem>>, vector<8x8xf32>
      %cst_57 = arith.constant dense<0.000000e+00> : vector<8xf32>
      %95 = vector.multi_reduction <add>, %94, %cst_57 [1] : vector<8x8xf32> to vector<8xf32>
      %96 = vector.shape_cast %95 : vector<8xf32> to vector<8x1xf32>
      %cst_58 = arith.constant dense<0.000000e+00> : vector<1xf32>
      %97 = vector.multi_reduction <add>, %96, %cst_58 [0] : vector<8x1xf32> to vector<1xf32>
      %98 = vector.shape_cast %97 : vector<1xf32> to vector<1x1xf32>
      %cst_59 = arith.constant 6.400000e+01 : f32
      %99 = vector.broadcast %cst_59 : f32 to vector<1x1xf32>
      %100 = arith.subf %99, %88 : vector<1x1xf32>
      %101 = arith.divf %93, %88 : vector<1x1xf32>
      %cst_60 = arith.constant 0.000000e+00 : f32
      %102 = vector.broadcast %cst_60 : f32 to vector<1x1xf32>
      %103 = arith.cmpf ogt, %100, %102 : vector<1x1xf32>
      %cst_61 = arith.constant 1.000000e+00 : f32
      %104 = vector.broadcast %cst_61 : f32 to vector<1x1xf32>
      %105 = arith.maximumf %100, %104 : vector<1x1xf32>
      %106 = arith.divf %98, %105 : vector<1x1xf32>
      %cst_62 = arith.constant 0.000000e+00 : f32
      %107 = vector.broadcast %cst_62 : f32 to vector<1x1xf32>
      %108 = arith.select %103, %106, %107 : vector<1x1xi1>, vector<1x1xf32>
      %109 = arith.addf %83, %101 : vector<1x1xf32>
      %110 = arith.addf %109, %108 : vector<1x1xf32>
      %c0_63 = arith.constant 0 : index
      %c0_64 = arith.constant 0 : index
      %111 = vector.load %arg7[%c0_63, %c0_64] : memref<1x1xf32, #tpu.memory_space<vmem>>, vector<1x1xf32>
      tpu.vector_store %arg7[%c0_63, %c0_64], %110 {strides = array<i32>} : memref<1x1xf32, #tpu.memory_space<vmem>>, vector<1x1xf32>,
    } else {
    }
    return
  }
  func.func @transform_0(%arg0: i32, %arg1: i32) -> (i32, i32) {
    %c0_i32 = arith.constant 0 : i32
    %c0_i32_0 = arith.constant 0 : i32
    return %arg0, %c0_i32 : i32, i32
  }
  func.func @transform_1(%arg0: i32, %arg1: i32) -> (i32, i32) {
    %c0_i32 = arith.constant 0 : i32
    %c0_i32_0 = arith.constant 0 : i32
    return %arg0, %c0_i32 : i32, i32
  }
  func.func @transform_2(%arg0: i32, %arg1: i32) -> (i32, i32) {
    %c0_i32 = arith.constant 0 : i32
    %c0_i32_0 = arith.constant 0 : i32
    return %arg1, %c0_i32 : i32, i32
  }
  func.func @transform_3(%arg0: i32, %arg1: i32) -> (i32, i32) {
    %c0_i32 = arith.constant 0 : i32
    %c0_i32_0 = arith.constant 0 : i32
    return %arg0, %c0_i32 : i32, i32
  }
  func.func @transform_4(%arg0: i32, %arg1: i32) -> (i32, i32) {
    %c0_i32 = arith.constant 0 : i32
    %c0_i32_0 = arith.constant 0 : i32
    return %c0_i32, %arg1 : i32, i32
  }
  func.func @transform_5(%arg0: i32, %arg1: i32) -> (i32, i32) {
    %c0_i32 = arith.constant 0 : i32
    %c0_i32_0 = arith.constant 0 : i32
    %c0_i32_1 = arith.constant 0 : i32
    return %c0_i32, %c0_i32_0 : i32, i32
  }
}

</mosaic_0001>

<bundles_post_ra>
// kernel: tpu_custom_call.1
= control target key start
LH: loop header
LB: loop body
LE: loop exit
PB: predicated region body
PF: predicated region fallthrough
CT: control target
= control target key end

     0   :  { %10 = vsyncpa [#allocation7], 0  ;;  %s511_s0 = inlined_call_operand.vmem [shape: f32[8,128], index: 0, kind: input, shape index: {}]   ;;  %s512_s1 = inlined_call_operand.hbm [shape: f32[8,128], index: 1, kind: input, shape index: {}]   ;;  %s513_s2 = inlined_call_operand.vmem [shape: f32[8,128], index: 2, kind: input, shape index: {}]   ;;  %s514_s3 = inlined_call_operand.vmem [shape: s32[8,1], index: 3, kind: input, shape index: {}]   ;;  %s515_s4 = inlined_call_operand.vmem [shape: s32[1,8], index: 4, kind: input, shape index: {}]   ;;  %s516_s5 = inlined_call_operand.hbm [shape: f32[1,1], index: 5, kind: output, shape index: {}]  }
   0x1   :  { %11 = vsyncpa [#allocation8], 0  ;;  %s412_s18 = smov [#allocation6]   ;;  %s364_s22 = scalar_lea.hbm %s512_s1, 128 }
   0x2   :  { %s20_s19 = sshll.u32 %s412_s18, 4  ;;  %p365_p0 = scmp.ne.s32.totalorder %s512_s1, %s364_s22  ;;  %s21_s19 = int_to_ptr.vmem [resolvable:$true] %s20_s19 }
   0x3   :  { %p368_p1 = scmp.lt.u32.totalorder %s364_s22, %s512_s1 }
   0x5   :  { %p370_p2 = pnand %p368_p1, %p365_p0 }
   0x7   :  { %373 = shalt.err (!%p370_p2)
}
   0x8   :  { %s374_s27 = scalar_lea.vmem %s21_s19, 128  ;;  %p379_p4 = scmp.lt.s32.totalorder %s21_s19, %s21_s19 }
   0x9   :  { %p375_p3 = scmp.ne.s32.totalorder %s21_s19, %s374_s27  ;;  %p380_p5 = scmp.lt.s32.totalorder %s374_s27, %s374_s27 }
   0xb   :  { %p381_p6 = por %p380_p5, %p379_p4 }
   0xd   :  { %p382_p7 = pnand %p381_p6, %p375_p3 }
   0xf   :  { %385 = shalt.err (!%p382_p7)
}
  0x10   :  { %23 = dma.hbm_to_vmem [thread:$0]  %s512_s1, 128, %s21_s19, [#allocation7]  }
  0x11   :  { %408 = dma.done.wait [#allocation7], 128  }
  0x12   :  { %409 = vsyncadd [#allocation7], 4294967168  ;;  %v413_v0 = vmov 0.0   ;;  %vm414_vm0 = vmmov 0   ;;  %v415_v1 = vmov 0   ;;  %v46_v2 = vld [vmem:[%s513_s2] sm:$0xff]  ;;  %v52_v11 = vlaneseq }
  0x13   :  { %345 = vmatprep.subr.mxu1 %v413_v0  ;;  %340 = vmatprep.subr.mxu0 %v413_v0  ;;  %v45_v3 = vld [vmem:[#allocation6] sm:$0xff]  ;;  %v147_v4 = vmul.f32 %v46_v2, %v46_v2  ;;  %v416_v6 = vmov 1.0   ;;  %vm41_vm1 = vcmask 64512   ;;  %vm39_vm2 = vcmask 7168  }
  0x14   :  { %347 = vmatprep.mubr.msk.f32.mxu1 %vm414_vm0, %v413_v0  ;;  %342 = vmatprep.mubr.msk.f32.mxu0 %vm414_vm0, %v413_v0  ;;  %v144_v5 = vmul.f32 %v45_v3, %v45_v3  ;;  %v229_v7 = vld [vmem:[%s514_s3] sm:$0xff]  ;;  %44 = vst.msk [vmem:[#allocation5] sm:$0xff] %vm41_vm1, %v413_v0  ;;  %42 = vst.msk [vmem:[#allocation3] sm:$0xff] %vm41_vm1, %v413_v0  ;;  %v53_v13 = vand.u32 127, %v52_v11  ;;  %vm417_vm6 = vmmov 1   ;;  %v219_v23 = vshrl.u32 %v52_v11, 7 }
  0x15   :  { %357 = vset.pattern.permute.xlu0 %v415_v1  ;;  %341 = vmatpush3.xpose.msra.mxu0 %v46_v2  ;;  %43 = vst.msk [vmem:[#allocation4] sm:$0xff] %vm41_vm1, %v413_v0  ;;  %v62_v8 = vld [vmem:[%s511_s0] sm:$0xff]  ;;  %s418_s0 = smov [#allocation9]   ;;  %vm317_vm10 = vcmask 0  }
  0x16   :  { %346 = vmatpush3.xpose.msra.mxu1 %v147_v4  ;;  %145 = vadd.xlane.f32.xlu0 %v144_v5  ;;  %v63_v9 = vsub.f32 %v62_v8, %v45_v3  ;;  %40 = vst.msk [vmem:[#allocation2] sm:$0xff] %vm39_vm2, %v413_v0  ;;  %v334_v14 = vld [vmem:[%s515_s4] ss:$0 sm:$0xff]  ;;  %vm58_vm3 = vcmp.lt.s32.totalorder %v53_v13, 8  ;;  %v220_v24 = vsub.s32 0, %v219_v23  ;;  %s325_s4 = sshll.u32 %s418_s0, 4  ;;  %s326_s4 = int_to_ptr.vmem [resolvable:$true] %s325_s4 }
  0x17   :  { %s386_s10 = scalar_lea.vmem %s326_s4, 16  ;;  %s390_s11 = scalar_lea.vmem %s326_s4, 32 }
  0x18   :  { %343 = vmatmul.mubr.f32.vlgmr.msra.gmra.mrb[0].mxu0 %v45_v3  ;;  %v64_v10 = vmul.f32 %v63_v9, %v63_v9  ;;  %p387_p8 = scmp.ne.s32.totalorder %s326_s4, %s386_s10  ;;  %p391_p9 = scmp.lt.s32.totalorder %s326_s4, %s326_s4 }
  0x19   :  { %348 = vmatmul.mubr.f32.vlgmr.msra.gmra.mrb[0].mxu1 %v416_v6  ;;  %p392_p10 = scmp.lt.s32.totalorder %s390_s11, %s386_s10 }
  0x1a   :  { %65 = vadd.xlane.f32.xlu1 %v64_v10 }
  0x1b   :  { %v259_v16 = vld [vmem:[#allocation5] sm:$0xff]  ;;  %v247_v37 = vld [vmem:[#allocation3] sm:$0xff]  ;;  %p393_p11 = por %p392_p10, %p391_p9 }
  0x1c   :  { %v252_v43 = vld [vmem:[#allocation4] sm:$0xff] }
  0x1d   :  { %v69_v47 = vld [vmem:[#allocation2] sm:$0xff]  ;;  %p394_p12 = pnand %p393_p11, %p387_p8 }
  0x2c   :  { %232 = vperm.xlu0 %357, %v229_v7  }
  0xa3   :  { %v146_v12 = vpop.xlane.xlu0 %145 }
  0xa7   :  { %v66_v42 = vpop.xlane.xlu1 %65 }
  0xa8   :  { %v67_v45 = vmax.f32 %v66_v42, 1e-12 }
  0xaa   :  { %v68_v49 = vmin.f32 %v67_v45, 1e+12 }
  0xab   :  { %v233_v15 = vpop.permute.xlu0 %232 }
  0xac   :  { %vm238_vm4 = vcmp.eq.s32.totalorder %v233_v15, %v334_v14  ;;  %v71_v51 = vadd.f32 %v69_v47, %v68_v49 }
  0xad   :  { %vm477_vm5 = vmand %vm58_vm3, %vm238_vm4 }
  0xae   :  { %vm245_vm7 = vmxor %vm238_vm4, %vm417_vm6  ;;  %v335_v18 = vsel %vm477_vm5, 1.0, %v413_v0  ;;  %73 = vst.msk [vmem:[#allocation2] sm:$0xff] %vm39_vm2, %v71_v51 }
  0xaf   :  { %vm483_vm8 = vmand %vm58_vm3, %vm245_vm7  ;;  %v262_v20 = vadd.f32 %v335_v18, %v259_v16 }
  0xb1   :  { %263 = vst.msk [vmem:[#allocation5] sm:$0xff] %vm41_vm1, %v262_v20 }
  0xb5   :  { %v266_v58 = vld [vmem:[#allocation2] sm:$0xff] }
  0xb6   :  { %v268_v59 = vsel %vm39_vm2, %v266_v58, 0.0 }
  0xb7   :  { %v269_v61 = vrot.slane %v268_v59, 4 }
  0xb8   :  { %v277_v21 = vld [vmem:[#allocation5] sm:$0xff] }
  0xb9   :  { %v278_v22 = vsel %vm41_vm1, %v277_v21, 0.0  ;;  %v270_v2 = vadd.f32 %v269_v61, %v268_v59 }
  0xba   :  { %279 = vadd.xlane.f32.xlu1 %v278_v22 }
  0xbb   :  { %v271_v6 = vrot.slane %v270_v2, 2 }
  0xbd   :  { %v272_v9 = vadd.f32 %v271_v6, %v270_v2 }
  0xbf   :  { %v273_v13 = vrot.slane %v272_v9, 1 }
  0xc1   :  { %v274_v17 = vadd.f32 %v273_v13, %v272_v9 }
  0xc3   :  { %v276_v22 = vmul.f32 0.125, %v274_v17 }
  0xeb   :  { %v140_v25 = vpop.f32.mrb[0].mxu0 }
  0xec   :  { %v344_v26 = vpop.f32.mrb[1].mxu0  ;;  %v214_v27 = vpop.f32.mrb[0].mxu1  ;;  %v223_v30 = vmul.f32 2.0, %v140_v25 }
  0xed   :  { %v221_v28 = vrot.slane %v214_v27, %v220_v24  ;;  %v349_v29 = vpop.f32.mrb[1].mxu1 }
  0xef   :  { %v222_v31 = vadd.f32 %v221_v28, %v146_v12 }
  0xf1   :  { %v224_v32 = vsub.f32 %v222_v31, %v223_v30 }
  0xf3   :  { %v225_v33 = vmul.f32 0.0078125, %v224_v32 }
  0xf5   :  { %v226_v34 = vmax.f32 %v225_v33, 0.0 }
  0xf7   :  { %v227_v35 = vmax.f32 %v226_v34, 1e-12 }
  0xf9   :  { %v228_v36 = vmin.f32 %v227_v35, 1e+12 }
  0xfb   :  { %v248_v38 = vsel %vm477_vm5, %v228_v36, 0.0  ;;  %v253_v39 = vadd.f32 1.0, %v228_v36 }
  0xfc   :  { %v249_v40 = vadd.f32 %v248_v38, %v247_v37 }
  0xfd   :  { %358 = vrcp.f32 %v253_v39 }
  0xfe   :  { %251 = vst.msk [vmem:[#allocation3] sm:$0xff] %vm41_vm1, %v249_v40 }
 0x105   :  { %v287_v41 = vld [vmem:[#allocation3] sm:$0xff] }
 0x106   :  { %v288_v44 = vsel %vm41_vm1, %v287_v41, 0.0 }
 0x107   :  { %v359_v46 = vpop.eup %358  ;;  %289 = vadd.xlane.f32.xlu1 %v288_v44 }
 0x108   :  { %v256_v48 = vsel %vm483_vm8, %v359_v46, 0.0 }
 0x109   :  { %v257_v50 = vadd.f32 %v256_v48, %v252_v43 }
 0x10b   :  { %258 = vst.msk [vmem:[#allocation4] sm:$0xff] %vm41_vm1, %v257_v50 }
 0x112   :  { %v297_v52 = vld [vmem:[#allocation4] sm:$0xff] }
 0x113   :  { %v298_v53 = vsel %vm41_vm1, %v297_v52, 0.0 }
 0x114   :  { %299 = vadd.xlane.f32.xlu1 %v298_v53 }
 0x147   :  { %v280_v54 = vpop.xlane.xlu1 %279 }
 0x148   :  { %v281_v55 = vrot.slane %v280_v54, 4 }
 0x14a   :  { %v282_v56 = vadd.f32 %v281_v55, %v280_v54 }
 0x14c   :  { %v283_v57 = vrot.slane %v282_v56, 2 }
 0x14e   :  { %v284_v60 = vadd.f32 %v283_v57, %v282_v56 }
 0x150   :  { %v285_v63 = vrot.slane %v284_v60, 1 }
 0x152   :  { %v286_v3 = vadd.f32 %v285_v63, %v284_v60 }
 0x154   :  { %v307_v4 = vsub.f32 64.0, %v286_v3  ;;  %360 = vrcp.f32 %v286_v3 }
 0x156   :  { %v311_v7 = vmax.f32 %v307_v4, 1.0  ;;  %vm310_vm9 = vcmp.gt.f32.partialorder %v307_v4, 0.0 }
 0x158   :  { %362 = vrcp.f32 %v311_v7 }
 0x15e   :  { %v361_v18 = vpop.eup %360 }
 0x162   :  { %v363_v24 = vpop.eup %362 }
 0x194   :  { %v290_v62 = vpop.xlane.xlu1 %289 }
 0x195   :  { %v291_v0 = vrot.slane %v290_v62, 4 }
 0x197   :  { %v292_v1 = vadd.f32 %v291_v0, %v290_v62 }
 0x199   :  { %v293_v5 = vrot.slane %v292_v1, 2 }
 0x19b   :  { %v294_v8 = vadd.f32 %v293_v5, %v292_v1 }
 0x19d   :  { %v295_v12 = vrot.slane %v294_v8, 1 }
 0x19f   :  { %v296_v16 = vadd.f32 %v295_v12, %v294_v8 }
 0x1a1   :  { %v300_v10 = vpop.xlane.xlu1 %299  ;;  %v309_v21 = vmul.f32 %v361_v18, %v296_v16 }
 0x1a2   :  { %v301_v11 = vrot.slane %v300_v10, 4 }
 0x1a3   :  { %v315_v26 = vadd.f32 %v309_v21, %v276_v22 }
 0x1a4   :  { %v302_v14 = vadd.f32 %v301_v11, %v300_v10 }
 0x1a6   :  { %v303_v15 = vrot.slane %v302_v14, 2 }
 0x1a8   :  { %v304_v19 = vadd.f32 %v303_v15, %v302_v14 }
 0x1aa   :  { %v305_v20 = vrot.slane %v304_v19, 1 }
 0x1ac   :  { %v306_v23 = vadd.f32 %v305_v20, %v304_v19 }
 0x1ae   :  { %v313_v25 = vmul.f32 %v363_v24, %v306_v23 }
 0x1b0   :  { %v314_v27 = vsel %vm310_vm9, %v313_v25, 0.0 }
 0x1b1   :  { %v316_v28 = vadd.f32 %v315_v26, %v314_v27 }
 0x1b3   :  { %318 = vst.msk [vmem:[#allocation9] sm:$0x1] %vm317_vm10, %v316_v28 }
 0x1b4   :  { %397 = shalt.err (!%p394_p12)
}
 0x1b5   :  { %s398_s14 = scalar_lea.hbm %s516_s5, 16 }
 0x1b6   :  { %p399_p13 = scmp.ne.s32.totalorder %s516_s5, %s398_s14  ;;  %p402_p0 = scmp.lt.u32.totalorder %s398_s14, %s516_s5 }
 0x1b8   :  { %p404_p1 = pnand %p402_p0, %p399_p13 }
 0x1ba   :  { %407 = shalt.err (!%p404_p1)
}
 0x1bb   :  { %328 = dma.vmem_to_hbm [thread:$0]  %s326_s4, 16, %s516_s5, [#allocation8]  }
 0x1bc   :  { %410 = dma.done.wait [#allocation8], 16  }
 0x1bd   :  { %411 = vsyncadd [#allocation8], 4294967280 }
 0x1be   :  { %332 = vsyncpa [#allocation7], 1 }
 0x1bf   :  { %333 = vsyncpa [#allocation8], 1 }

</bundles_post_ra>
